<compile_context>
chip_gen: v6e
topology: v6e:2x2x1
jax: 0.10.0
libtpu: 0.0.40
codegen_flags: <defaults>
</compile_context>

<pallas_src>
import jax
import jax.numpy as jnp
from jax.experimental import pallas as pl
from jax.experimental.pallas import tpu as pltpu


def _round_up(x, m):
    return (x + m - 1) // m * m


def bow_kernel(y_ref, z_ref, w1y_ref, w1z_ref, b1_ref, w2_ref, b2_ref, tgt_ref,
               out_ref, h_ref, m_ref, l_ref, num_ref, den_ref):
    vj = pl.program_id(1)

    @pl.when(vj == 0)
    def _init():
        # Hidden layer (Linear + ReLU).  The yvecs/zvecs concat is fused as two
        # bf16 MXU matmuls against the pre-split halves of w1 (f32 accumulate).
        xw = jnp.dot(y_ref[...].astype(jnp.bfloat16), w1y_ref[...],
                     preferred_element_type=jnp.float32)
        xw = xw + jnp.dot(z_ref[...].astype(jnp.bfloat16), w1z_ref[...],
                          preferred_element_type=jnp.float32)
        h_ref[...] = jnp.maximum(xw + b1_ref[...], 0.0).astype(jnp.bfloat16)
        # Streaming log-softmax / loss accumulators.
        m_ref[...] = jnp.full(m_ref.shape, -jnp.inf, m_ref.dtype)
        l_ref[...] = jnp.zeros(l_ref.shape, l_ref.dtype)
        num_ref[...] = jnp.zeros(num_ref.shape, num_ref.dtype)
        den_ref[...] = jnp.zeros(den_ref.shape, den_ref.dtype)

    # Output-layer logits for this vocab tile (bf16 MXU, f32 accumulate).
    logits = jnp.dot(h_ref[...], w2_ref[...],
                     preferred_element_type=jnp.float32) + b2_ref[...]
    t = tgt_ref[...].astype(jnp.float32)

    # Online max / log-sum-exp plus partial loss numerator / denominator.
    m_prev = m_ref[...]
    m_new = jnp.maximum(m_prev, jnp.max(logits, axis=-1, keepdims=True))
    l_ref[...] = (jnp.exp(m_prev - m_new) * l_ref[...]
                  + jnp.sum(jnp.exp(logits - m_new), axis=-1, keepdims=True))
    num_ref[...] += jnp.sum(logits * t, axis=-1, keepdims=True)
    den_ref[...] += jnp.sum(t, axis=-1, keepdims=True)
    m_ref[...] = m_new

    @pl.when(vj == pl.num_programs(1) - 1)
    def _finalize():
        # loss_row = lse - sum(logits*tgts)/sum(tgts); logp never materialized.
        # Exact divide: runs once per batch tile on a (TB, 1) vector, so the
        # approx-reciprocal error is not worth saving.
        # NOTE: like the PyTorch module, rows with sum(tgts) == 0 produce NaN
        # (padded batch rows hit this path but are sliced away in the wrapper).
        lse = m_ref[...] + jnp.log(l_ref[...])
        out_ref[...] = lse - num_ref[...] / den_ref[...]


def bag_of_words_forward(yvecs, zvecs, tgts, tgts_mask, params):
    # tgts_mask is unused in the PyTorch forward as well.
    del tgts_mask
    w1, b1, w2, b2 = params
    B, dy = yvecs.shape
    dz = zvecs.shape[1]
    din, H = w1.shape
    V = w2.shape[1]
    assert din == dy + dz

    # Split w1 in the wrapper so the kernel never slices at row offset dy
    # (which would cross bf16 sublane-packing boundaries when dy % 16 != 0).
    w1y = w1[:dy]
    w1z = w1[dy:]

    y_isz = jnp.dtype(yvecs.dtype).itemsize
    z_isz = jnp.dtype(zvecs.dtype).itemsize
    t_isz = jnp.dtype(tgts.dtype).itemsize
    w1_isz = jnp.dtype(w1.dtype).itemsize
    b1_isz = jnp.dtype(b1.dtype).itemsize
    w2_isz = jnp.dtype(w2.dtype).itemsize
    b2_isz = jnp.dtype(b2.dtype).itemsize

    def footprint(tb, tv):
        return (
            # double-buffered streamed blocks
            2 * tb * dy * y_isz + 2 * tb * dz * z_isz
            + 2 * H * tv * w2_isz + 2 * tv * b2_isz
            + 2 * tb * tv * t_isz
            + 2 * tb * 4
            # constant blocks (still double-buffered by the auto pipeline)
            + 2 * (dy + dz) * H * w1_isz + 2 * H * b1_isz
            # scratch: bf16 hidden activations + 4 f32 accumulators
            + tb * H * 2 + 4 * tb * 4
            # compiler f32 temporaries for the (tb, tv) logits / exp / logits*t
            + 3 * tb * tv * 4
        )

    # ---- footprint-driven tile selection (generation-aware via VMEM size) ----
    try:
        vmem_cap = int(pltpu.get_tpu_info().vmem_capacity_bytes)
    except Exception:
        vmem_cap = 64 * 1024 * 1024     # conservative (v7x) fallback
    budget = vmem_cap * 3 // 4

    TB = min(_round_up(B, 8), 1024)     # big TB => w2 streamed (near-)once total
    V128 = _round_up(V, 128)
    TV = None
    while TV is None:
        tv = min(V128, 4096)
        while tv >= 128 and footprint(TB, tv) > budget:
            tv -= 128
        if tv >= 128:
            TV = tv
        elif TB > 8:
            TB = _round_up(max(TB // 2, 8), 8)
        else:
            # TODO(synk): add an H-contraction grid axis for very wide hidden
            # layers where a single (H, 128) w2 block cannot fit in VMEM.
            TV = 128

    # Rebalance tiles to minimize padding without changing the step count.
    nb = -(-B // TB)
    TB = _round_up(-(-B // nb), 8)
    nv = -(-V // TV)
    TV = _round_up(-(-V // nv), 128)
    B_pad, V_pad = nb * TB, nv * TV

    # ---- padding (no-ops at aligned shapes; padded rows sliced away below) ----
    if B_pad != B:
        yvecs = jnp.pad(yvecs, ((0, B_pad - B), (0, 0)))
        zvecs = jnp.pad(zvecs, ((0, B_pad - B), (0, 0)))
        tgts = jnp.pad(tgts, ((0, B_pad - B), (0, 0)))
    if V_pad != V:
        w2 = jnp.pad(w2, ((0, 0), (0, V_pad - V)))
        # -1e30 bias pushes padded vocab columns out of the softmax.
        b2 = jnp.pad(b2, ((0, 0), (0, V_pad - V)), constant_values=-1e30)
        tgts = jnp.pad(tgts, ((0, 0), (0, V_pad - V)))

    # Explicit scoped-VMEM limit from the actual footprint (incl. f32 temps).
    vmem_limit = int(min(vmem_cap * 9 // 10,
                         max(32 * 1024 * 1024, footprint(TB, TV) + (8 << 20))))

    # TODO(synk): pin the constant w1y/w1z/b1 blocks to a single buffer
    # (pipeline_mode=pl.Buffered(1)) once single-buffering is verified on this
    # toolchain; their second buffer is already charged in footprint() above.
    per_row = pl.pallas_call(
        bow_kernel,
        out_shape=jax.ShapeDtypeStruct((B_pad, 1), jnp.float32),
        grid_spec=pltpu.PrefetchScalarGridSpec(
            num_scalar_prefetch=0,
            grid=(nb, nv),                                        # vocab (reduction) last
            in_specs=[
                pl.BlockSpec((TB, dy), lambda bi, vj: (bi, 0)),   # yvecs
                pl.BlockSpec((TB, dz), lambda bi, vj: (bi, 0)),   # zvecs
                pl.BlockSpec((dy, H), lambda bi, vj: (0, 0)),     # w1[:dy] (whole)
                pl.BlockSpec((dz, H), lambda bi, vj: (0, 0)),     # w1[dy:] (whole)
                pl.BlockSpec((1, H), lambda bi, vj: (0, 0)),      # b1 (whole)
                pl.BlockSpec((H, TV), lambda bi, vj: (0, vj)),    # w2 vocab tile
                pl.BlockSpec((1, TV), lambda bi, vj: (0, vj)),    # b2 vocab tile
                pl.BlockSpec((TB, TV), lambda bi, vj: (bi, vj)),  # tgts tile
            ],
            out_specs=pl.BlockSpec((TB, 1), lambda bi, vj: (bi, 0)),
            scratch_shapes=[
                pltpu.VMEM((TB, H), jnp.bfloat16),  # hidden activations
                pltpu.VMEM((TB, 1), jnp.float32),   # running max
                pltpu.VMEM((TB, 1), jnp.float32),   # running sum(exp)
                pltpu.VMEM((TB, 1), jnp.float32),   # sum(logits * tgts)
                pltpu.VMEM((TB, 1), jnp.float32),   # sum(tgts)
            ],
        ),
        compiler_params=pltpu.CompilerParams(
            dimension_semantics=("parallel", "arbitrary"),
            vmem_limit_bytes=vmem_limit,
        ),
    )(yvecs, zvecs, w1y, w1z, b1, w2, b2, tgts)

    # Tiny final mean over B rows (kept outside so the batch axis can stay
    # "parallel" across TensorCores without racing on a shared scalar output).
    return jnp.mean(per_row[:B, 0])


def init_params(key, in_dim, hidden, vocab):
    k1, k2, k3, k4 = jax.random.split(key, 4)
    s1 = 1.0 / jnp.sqrt(in_dim)
    s2 = 1.0 / jnp.sqrt(hidden)
    # Weights stored bf16 (MXU-native, halves the dominant w2 DMA stream).
    w1 = jax.random.uniform(k1, (in_dim, hidden), jnp.float32, -s1, s1).astype(jnp.bfloat16)
    b1 = jax.random.uniform(k2, (1, hidden), jnp.float32, -s1, s1)
    w2 = jax.random.uniform(k3, (hidden, vocab), jnp.float32, -s2, s2).astype(jnp.bfloat16)
    b2 = jax.random.uniform(k4, (1, vocab), jnp.float32, -s2, s2)
    return w1, b1, w2, b2


if __name__ == "__main__":
    # Small, module-consistent shapes.
    B, ysize, zsize, hidden, vocab = 8, 16, 16, 32, 128

    key = jax.random.PRNGKey(0)
    ky, kz, kt, kp = jax.random.split(key, 4)
    yvecs = jax.random.normal(ky, (B, ysize), jnp.float32)
    zvecs = jax.random.normal(kz, (B, zsize), jnp.float32)
    # Bag-of-words target counts kept in f32 so arbitrarily large counts stay exact.
    tgts = jax.random.randint(kt, (B, vocab), 0, 3).astype(jnp.float32)
    tgts = tgts.at[:, 0].set(tgts[:, 0] + 1.0)  # ensure every row has >= 1 word
    tgts_mask = jnp.ones((B, vocab), jnp.float32)

    params = init_params(kp, ysize + zsize, hidden, vocab)

    loss = bag_of_words_forward(yvecs, zvecs, tgts, tgts_mask, params)
    jax.block_until_ready(loss)

    # Pure-JAX f32 reference (same bf16-stored weights cast up; only in-kernel
    # bf16 activations differ, so the tolerance can be fairly tight).
    w1, b1, w2, b2 = params
    x = jnp.concatenate([yvecs, zvecs], -1)
    h = jnp.maximum(x @ w1.astype(jnp.float32) + b1, 0.0)
    lg = jax.nn.log_softmax(h @ w2.astype(jnp.float32) + b2, axis=-1)
    ref = -jnp.mean(jnp.sum(lg * tgts, 1) / jnp.sum(tgts, 1))
    assert jnp.allclose(loss, ref, rtol=1e-2, atol=1e-2), (loss, ref)

    print("KERNEL_OK")
</pallas_src>

<mosaic_0001>
module attributes {stable_mosaic.version = 11 : i64} {
  func.func @bow_kernel(%arg0: i32, %arg1: i32, %arg2: memref<8x16xf32, #tpu.memory_space<vmem>>, %arg3: memref<8x16xf32, #tpu.memory_space<vmem>>, %arg4: memref<16x32xbf16, #tpu.memory_space<vmem>>, %arg5: memref<16x32xbf16, #tpu.memory_space<vmem>>, %arg6: memref<1x32xf32, #tpu.memory_space<vmem>>, %arg7: memref<32x128xbf16, #tpu.memory_space<vmem>>, %arg8: memref<1x128xf32, #tpu.memory_space<vmem>>, %arg9: memref<8x128xf32, #tpu.memory_space<vmem>>, %arg10: memref<8x1xf32, #tpu.memory_space<vmem>>, %arg11: memref<8x32xbf16, #tpu.memory_space<vmem>>, %arg12: memref<8x1xf32, #tpu.memory_space<vmem>>, %arg13: memref<8x1xf32, #tpu.memory_space<vmem>>, %arg14: memref<8x1xf32, #tpu.memory_space<vmem>>, %arg15: memref<8x1xf32, #tpu.memory_space<vmem>>) attributes {dimension_semantics = [#tpu.dimension_semantics<parallel>, #tpu.dimension_semantics<arbitrary>], iteration_bounds = array<i64: 1, 1>, scalar_prefetch = 0 : i64, scratch_operands = 5 : i64, tpu.core_type = #tpu.core_type<tc>, window_params = [{transform_indices = @transform_0, window_bounds = array<i64: 8, 16>}, {transform_indices = @transform_1, window_bounds = array<i64: 8, 16>}, {pipeline_mode = #tpu.pipeline_mode<synchronous>, transform_indices = @transform_2, window_bounds = array<i64: 16, 32>}, {pipeline_mode = #tpu.pipeline_mode<synchronous>, transform_indices = @transform_3, window_bounds = array<i64: 16, 32>}, {pipeline_mode = #tpu.pipeline_mode<synchronous>, transform_indices = @transform_4, window_bounds = array<i64: 1, 32>}, {transform_indices = @transform_5, window_bounds = array<i64: 32, 128>}, {transform_indices = @transform_6, window_bounds = array<i64: 1, 128>}, {transform_indices = @transform_7, window_bounds = array<i64: 8, 128>}, {transform_indices = @transform_8, window_bounds = array<i64: 8, 1>}]} {
    %c0_i32 = arith.constant 0 : i32
    %0 = arith.cmpi eq, %arg1, %c0_i32 : i32
    %1 = arith.extui %0 : i1 to i32
    %c0_i32_0 = arith.constant 0 : i32
    %2 = arith.cmpi ne, %1, %c0_i32_0 : i32
    scf.if %2 {
      %c0_30 = arith.constant 0 : index
      %c0_31 = arith.constant 0 : index
      %40 = vector.load %arg2[%c0_30, %c0_31] : memref<8x16xf32, #tpu.memory_space<vmem>>, vector<8x16xf32>
      %41 = arith.truncf %40 : vector<8x16xf32> to vector<8x16xbf16>
      %c0_32 = arith.constant 0 : index
      %c0_33 = arith.constant 0 : index
      %42 = vector.load %arg4[%c0_32, %c0_33] : memref<16x32xbf16, #tpu.memory_space<vmem>>, vector<16x32xbf16>
      %cst_34 = arith.constant dense<0.000000e+00> : vector<8x32xf32>
      %43 = tpu.matmul %41, %42, %cst_34 {dimension_numbers = #tpu.dot_dimension_numbers<[1], [0], [0], [1], [0, 0, 1, 1], [], []>} : vector<8x16xbf16>, vector<16x32xbf16>, vector<8x32xf32> -> vector<8x32xf32>
      %c0_35 = arith.constant 0 : index
      %c0_36 = arith.constant 0 : index
      %44 = vector.load %arg3[%c0_35, %c0_36] : memref<8x16xf32, #tpu.memory_space<vmem>>, vector<8x16xf32>
      %45 = arith.truncf %44 : vector<8x16xf32> to vector<8x16xbf16>
      %c0_37 = arith.constant 0 : index
      %c0_38 = arith.constant 0 : index
      %46 = vector.load %arg5[%c0_37, %c0_38] : memref<16x32xbf16, #tpu.memory_space<vmem>>, vector<16x32xbf16>
      %cst_39 = arith.constant dense<0.000000e+00> : vector<8x32xf32>
      %47 = tpu.matmul %45, %46, %cst_39 {dimension_numbers = #tpu.dot_dimension_numbers<[1], [0], [0], [1], [0, 0, 1, 1], [], []>} : vector<8x16xbf16>, vector<16x32xbf16>, vector<8x32xf32> -> vector<8x32xf32>
      %48 = arith.addf %43, %47 : vector<8x32xf32>
      %c0_40 = arith.constant 0 : index
      %c0_41 = arith.constant 0 : index
      %49 = vector.load %arg6[%c0_40, %c0_41] : memref<1x32xf32, #tpu.memory_space<vmem>>, vector<1x32xf32>
      %50 = vector.broadcast %49 : vector<1x32xf32> to vector<8x32xf32>
      %51 = arith.addf %48, %50 : vector<8x32xf32>
      %cst_42 = arith.constant 0.000000e+00 : f32
      %52 = vector.broadcast %cst_42 : f32 to vector<8x32xf32>
      %53 = arith.maximumf %51, %52 : vector<8x32xf32>
      %54 = arith.truncf %53 : vector<8x32xf32> to vector<8x32xbf16>
      %c0_43 = arith.constant 0 : index
      %c0_44 = arith.constant 0 : index
      %55 = vector.load %arg11[%c0_43, %c0_44] : memref<8x32xbf16, #tpu.memory_space<vmem>>, vector<8x32xbf16>
      tpu.vector_store %arg11[%c0_43, %c0_44], %54 {strides = array<i32>} : memref<8x32xbf16, #tpu.memory_space<vmem>>, vector<8x32xbf16>,
      %cst_45 = arith.constant 0xFF800000 : f32
      %56 = vector.broadcast %cst_45 : f32 to vector<8x1xf32>
      %c0_46 = arith.constant 0 : index
      %c0_47 = arith.constant 0 : index
      %57 = vector.load %arg12[%c0_46, %c0_47] : memref<8x1xf32, #tpu.memory_space<vmem>>, vector<8x1xf32>
      tpu.vector_store %arg12[%c0_46, %c0_47], %56 {strides = array<i32>} : memref<8x1xf32, #tpu.memory_space<vmem>>, vector<8x1xf32>,
      %cst_48 = arith.constant 0.000000e+00 : f32
      %58 = vector.broadcast %cst_48 : f32 to vector<8x1xf32>
      %c0_49 = arith.constant 0 : index
      %c0_50 = arith.constant 0 : index
      %59 = vector.load %arg13[%c0_49, %c0_50] : memref<8x1xf32, #tpu.memory_space<vmem>>, vector<8x1xf32>
      tpu.vector_store %arg13[%c0_49, %c0_50], %58 {strides = array<i32>} : memref<8x1xf32, #tpu.memory_space<vmem>>, vector<8x1xf32>,
      %cst_51 = arith.constant 0.000000e+00 : f32
      %60 = vector.broadcast %cst_51 : f32 to vector<8x1xf32>
      %c0_52 = arith.constant 0 : index
      %c0_53 = arith.constant 0 : index
      %61 = vector.load %arg14[%c0_52, %c0_53] : memref<8x1xf32, #tpu.memory_space<vmem>>, vector<8x1xf32>
      tpu.vector_store %arg14[%c0_52, %c0_53], %60 {strides = array<i32>} : memref<8x1xf32, #tpu.memory_space<vmem>>, vector<8x1xf32>,
      %cst_54 = arith.constant 0.000000e+00 : f32
      %62 = vector.broadcast %cst_54 : f32 to vector<8x1xf32>
      %c0_55 = arith.constant 0 : index
      %c0_56 = arith.constant 0 : index
      %63 = vector.load %arg15[%c0_55, %c0_56] : memref<8x1xf32, #tpu.memory_space<vmem>>, vector<8x1xf32>
      tpu.vector_store %arg15[%c0_55, %c0_56], %62 {strides = array<i32>} : memref<8x1xf32, #tpu.memory_space<vmem>>, vector<8x1xf32>,
    } else {
    }
    %c0 = arith.constant 0 : index
    %c0_1 = arith.constant 0 : index
    %3 = vector.load %arg11[%c0, %c0_1] : memref<8x32xbf16, #tpu.memory_space<vmem>>, vector<8x32xbf16>
    %c0_2 = arith.constant 0 : index
    %c0_3 = arith.constant 0 : index
    %4 = vector.load %arg7[%c0_2, %c0_3] : memref<32x128xbf16, #tpu.memory_space<vmem>>, vector<32x128xbf16>
    %cst = arith.constant dense<0.000000e+00> : vector<8x128xf32>
    %5 = tpu.matmul %3, %4, %cst {dimension_numbers = #tpu.dot_dimension_numbers<[1], [0], [0], [1], [0, 0, 1, 1], [], []>} : vector<8x32xbf16>, vector<32x128xbf16>, vector<8x128xf32> -> vector<8x128xf32>
    %c0_4 = arith.constant 0 : index
    %c0_5 = arith.constant 0 : index
    %6 = vector.load %arg8[%c0_4, %c0_5] : memref<1x128xf32, #tpu.memory_space<vmem>>, vector<1x128xf32>
    %7 = vector.broadcast %6 : vector<1x128xf32> to vector<8x128xf32>
    %8 = arith.addf %5, %7 : vector<8x128xf32>
    %c0_6 = arith.constant 0 : index
    %c0_7 = arith.constant 0 : index
    %9 = vector.load %arg9[%c0_6, %c0_7] : memref<8x128xf32, #tpu.memory_space<vmem>>, vector<8x128xf32>
    %c0_8 = arith.constant 0 : index
    %c0_9 = arith.constant 0 : index
    %10 = vector.load %arg12[%c0_8, %c0_9] : memref<8x1xf32, #tpu.memory_space<vmem>>, vector<8x1xf32>
    %cst_10 = arith.constant dense<0xFF800000> : vector<8xf32>
    %11 = vector.multi_reduction <maximumf>, %8, %cst_10 [1] : vector<8x128xf32> to vector<8xf32>
    %12 = vector.shape_cast %11 : vector<8xf32> to vector<8x1xf32>
    %13 = arith.maximumf %10, %12 : vector<8x1xf32>
    %14 = arith.subf %10, %13 : vector<8x1xf32>
    %15 = math.exp %14 : vector<8x1xf32>
    %c0_11 = arith.constant 0 : index
    %c0_12 = arith.constant 0 : index
    %16 = vector.load %arg13[%c0_11, %c0_12] : memref<8x1xf32, #tpu.memory_space<vmem>>, vector<8x1xf32>
    %17 = arith.mulf %15, %16 : vector<8x1xf32>
    %18 = vector.broadcast %13 : vector<8x1xf32> to vector<8x128xf32>
    %19 = arith.subf %8, %18 : vector<8x128xf32>
    %20 = math.exp %19 : vector<8x128xf32>
    %cst_13 = arith.constant dense<0.000000e+00> : vector<8xf32>
    %21 = vector.multi_reduction <add>, %20, %cst_13 [1] : vector<8x128xf32> to vector<8xf32>
    %22 = vector.shape_cast %21 : vector<8xf32> to vector<8x1xf32>
    %23 = arith.addf %17, %22 : vector<8x1xf32>
    %c0_14 = arith.constant 0 : index
    %c0_15 = arith.constant 0 : index
    %24 = vector.load %arg13[%c0_14, %c0_15] : memref<8x1xf32, #tpu.memory_space<vmem>>, vector<8x1xf32>
    tpu.vector_store %arg13[%c0_14, %c0_15], %23 {strides = array<i32>} : memref<8x1xf32, #tpu.memory_space<vmem>>, vector<8x1xf32>,
    %c0_16 = arith.constant 0 : index
    %c0_17 = arith.constant 0 : index
    %25 = vector.load %arg14[%c0_16, %c0_17] : memref<8x1xf32, #tpu.memory_space<vmem>>, vector<8x1xf32>
    %26 = arith.mulf %8, %9 : vector<8x128xf32>
    %cst_18 = arith.constant dense<0.000000e+00> : vector<8xf32>
    %27 = vector.multi_reduction <add>, %26, %cst_18 [1] : vector<8x128xf32> to vector<8xf32>
    %28 = vector.shape_cast %27 : vector<8xf32> to vector<8x1xf32>
    %29 = arith.addf %25, %28 : vector<8x1xf32>
    %c0_19 = arith.constant 0 : index
    %c0_20 = arith.constant 0 : index
    %30 = vector.load %arg14[%c0_19, %c0_20] : memref<8x1xf32, #tpu.memory_space<vmem>>, vector<8x1xf32>
    tpu.vector_store %arg14[%c0_19, %c0_20], %29 {strides = array<i32>} : memref<8x1xf32, #tpu.memory_space<vmem>>, vector<8x1xf32>,
    %c0_21 = arith.constant 0 : index
    %c0_22 = arith.constant 0 : index
    %31 = vector.load %arg15[%c0_21, %c0_22] : memref<8x1xf32, #tpu.memory_space<vmem>>, vector<8x1xf32>
    %cst_23 = arith.constant dense<0.000000e+00> : vector<8xf32>
    %32 = vector.multi_reduction <add>, %9, %cst_23 [1] : vector<8x128xf32> to vector<8xf32>
    %33 = vector.shape_cast %32 : vector<8xf32> to vector<8x1xf32>
    %34 = arith.addf %31, %33 : vector<8x1xf32>
    %c0_24 = arith.constant 0 : index
    %c0_25 = arith.constant 0 : index
    %35 = vector.load %arg15[%c0_24, %c0_25] : memref<8x1xf32, #tpu.memory_space<vmem>>, vector<8x1xf32>
    tpu.vector_store %arg15[%c0_24, %c0_25], %34 {strides = array<i32>} : memref<8x1xf32, #tpu.memory_space<vmem>>, vector<8x1xf32>,
    %c0_26 = arith.constant 0 : index
    %c0_27 = arith.constant 0 : index
    %36 = vector.load %arg12[%c0_26, %c0_27] : memref<8x1xf32, #tpu.memory_space<vmem>>, vector<8x1xf32>
    tpu.vector_store %arg12[%c0_26, %c0_27], %13 {strides = array<i32>} : memref<8x1xf32, #tpu.memory_space<vmem>>, vector<8x1xf32>,
    %c0_i32_28 = arith.constant 0 : i32
    %37 = arith.cmpi eq, %arg1, %c0_i32_28 : i32
    %38 = arith.extui %37 : i1 to i32
    %c0_i32_29 = arith.constant 0 : i32
    %39 = arith.cmpi ne, %38, %c0_i32_29 : i32
    scf.if %39 {
      %c0_30 = arith.constant 0 : index
      %c0_31 = arith.constant 0 : index
      %40 = vector.load %arg12[%c0_30, %c0_31] : memref<8x1xf32, #tpu.memory_space<vmem>>, vector<8x1xf32>
      %c0_32 = arith.constant 0 : index
      %c0_33 = arith.constant 0 : index
      %41 = vector.load %arg13[%c0_32, %c0_33] : memref<8x1xf32, #tpu.memory_space<vmem>>, vector<8x1xf32>
      %42 = math.log %41 : vector<8x1xf32>
      %43 = arith.addf %40, %42 : vector<8x1xf32>
      %c0_34 = arith.constant 0 : index
      %c0_35 = arith.constant 0 : index
      %44 = vector.load %arg14[%c0_34, %c0_35] : memref<8x1xf32, #tpu.memory_space<vmem>>, vector<8x1xf32>
      %c0_36 = arith.constant 0 : index
      %c0_37 = arith.constant 0 : index
      %45 = vector.load %arg15[%c0_36, %c0_37] : memref<8x1xf32, #tpu.memory_space<vmem>>, vector<8x1xf32>
      %46 = arith.divf %44, %45 : vector<8x1xf32>
      %47 = arith.subf %43, %46 : vector<8x1xf32>
      %c0_38 = arith.constant 0 : index
      %c0_39 = arith.constant 0 : index
      %48 = vector.load %arg10[%c0_38, %c0_39] : memref<8x1xf32, #tpu.memory_space<vmem>>, vector<8x1xf32>
      tpu.vector_store %arg10[%c0_38, %c0_39], %47 {strides = array<i32>} : memref<8x1xf32, #tpu.memory_space<vmem>>, vector<8x1xf32>,
    } else {
    }
    return
  }
  func.func @transform_0(%arg0: i32, %arg1: i32) -> (i32, i32) {
    %c0_i32 = arith.constant 0 : i32
    %c0_i32_0 = arith.constant 0 : i32
    return %arg0, %c0_i32 : i32, i32
  }
  func.func @transform_1(%arg0: i32, %arg1: i32) -> (i32, i32) {
    %c0_i32 = arith.constant 0 : i32
    %c0_i32_0 = arith.constant 0 : i32
    return %arg0, %c0_i32 : i32, i32
  }
  func.func @transform_2(%arg0: i32, %arg1: i32) -> (i32, i32) {
    %c0_i32 = arith.constant 0 : i32
    %c0_i32_0 = arith.constant 0 : i32
    %c0_i32_1 = arith.constant 0 : i32
    return %c0_i32, %c0_i32_0 : i32, i32
  }
  func.func @transform_3(%arg0: i32, %arg1: i32) -> (i32, i32) {
    %c0_i32 = arith.constant 0 : i32
    %c0_i32_0 = arith.constant 0 : i32
    %c0_i32_1 = arith.constant 0 : i32
    return %c0_i32, %c0_i32_0 : i32, i32
  }
  func.func @transform_4(%arg0: i32, %arg1: i32) -> (i32, i32) {
    %c0_i32 = arith.constant 0 : i32
    %c0_i32_0 = arith.constant 0 : i32
    %c0_i32_1 = arith.constant 0 : i32
    return %c0_i32, %c0_i32_0 : i32, i32
  }
  func.func @transform_5(%arg0: i32, %arg1: i32) -> (i32, i32) {
    %c0_i32 = arith.constant 0 : i32
    %c0_i32_0 = arith.constant 0 : i32
    return %c0_i32, %arg1 : i32, i32
  }
  func.func @transform_6(%arg0: i32, %arg1: i32) -> (i32, i32) {
    %c0_i32 = arith.constant 0 : i32
    %c0_i32_0 = arith.constant 0 : i32
    return %c0_i32, %arg1 : i32, i32
  }
  func.func @transform_7(%arg0: i32, %arg1: i32) -> (i32, i32) {
    %c0_i32 = arith.constant 0 : i32
    return %arg0, %arg1 : i32, i32
  }
  func.func @transform_8(%arg0: i32, %arg1: i32) -> (i32, i32) {
    %c0_i32 = arith.constant 0 : i32
    %c0_i32_0 = arith.constant 0 : i32
    return %arg0, %c0_i32 : i32, i32
  }
}

</mosaic_0001>

<bundles_post_ra>
// kernel: tpu_custom_call.1
= control target key start
LH: loop header
LB: loop body
LE: loop exit
PB: predicated region body
PF: predicated region fallthrough
CT: control target
= control target key end

     0   :  { %13 = vsyncpa [#allocation8], 0  ;;  %s613_s0 = inlined_call_operand.hbm [shape: f32[8,16], index: 0, kind: input, shape index: {}]   ;;  %s614_s1 = inlined_call_operand.hbm [shape: f32[8,16], index: 1, kind: input, shape index: {}]   ;;  %s615_s2 = inlined_call_operand.hbm [shape: bf16[16,32], index: 2, kind: input, shape index: {}]   ;;  %s616_s3 = inlined_call_operand.hbm [shape: bf16[16,32], index: 3, kind: input, shape index: {}]   ;;  %s617_s4 = inlined_call_operand.vmem [shape: f32[1,32], index: 4, kind: input, shape index: {}]   ;;  %s618_s5 = inlined_call_operand.hbm [shape: bf16[32,128], index: 5, kind: input, shape index: {}]   ;;  %s619_s6 = inlined_call_operand.vmem [shape: f32[1,128], index: 6, kind: input, shape index: {}]   ;;  %s620_s7 = inlined_call_operand.vmem [shape: f32[8,128], index: 7, kind: input, shape index: {}]   ;;  %s621_s8 = inlined_call_operand.vmem [shape: f32[8,1], index: 8, kind: output, shape index: {}]  }
   0x1   :  { %14 = vsyncpa [#allocation10], 0 }
   0x2   :  { %15 = vsyncpa [#allocation13], 0  ;;  %s512_s27 = smov [#allocation9]  }
   0x3   :  { %s32_s28 = sshll.u32 %s512_s27, 4  ;;  %s33_s28 = int_to_ptr.vmem [resolvable:$true] %s32_s28 }
   0x4   :  { %s414_s29 = scalar_lea.vmem %s33_s28, 128  ;;  %p419_p1 = scmp.lt.s32.totalorder %s33_s28, %s33_s28 }
   0x5   :  { %p415_p0 = scmp.ne.s32.totalorder %s33_s28, %s414_s29  ;;  %p420_p2 = scmp.lt.s32.totalorder %s414_s29, %s414_s29 }
   0x7   :  { %p421_p3 = por %p420_p2, %p419_p1 }
   0x9   :  { %p422_p4 = pnand %p421_p3, %p415_p0 }
   0xb   :  { %425 = shalt.err (!%p422_p4)
}
   0xc   :  { %35 = dma.hbm_to_vmem [thread:$0]  %s614_s1, 128, %s33_s28, [#allocation10]  }
   0xd   :  { %s513_s10 = smov [#allocation12]   ;;  %s514_s12 = smov [#allocation7]  }
   0xe   :  { %s53_s11 = sshll.u32 %s513_s10, 4  ;;  %s22_s13 = sshll.u32 %s514_s12, 4  ;;  %s54_s11 = int_to_ptr.vmem [resolvable:$true] %s53_s11  ;;  %s23_s13 = int_to_ptr.vmem [resolvable:$true] %s22_s13 }
   0xf   :  { %s434_s14 = scalar_lea.vmem %s54_s11, 128  ;;  %p439_p6 = scmp.lt.s32.totalorder %s54_s11, %s54_s11 }
  0x10   :  { %p435_p5 = scmp.ne.s32.totalorder %s54_s11, %s434_s14  ;;  %p440_p7 = scmp.lt.s32.totalorder %s434_s14, %s434_s14 }
  0x12   :  { %p441_p8 = por %p440_p7, %p439_p6 }
  0x14   :  { %p442_p9 = pnand %p441_p8, %p435_p5 }
  0x16   :  { %445 = shalt.err (!%p442_p9)
}
  0x17   :  { %s515_s15 = smov 64   ;;  %s516_s16 = smov 4  }
  0x18   :  { %59 = dma.hbm_to_vmem [thread:$0]  %s616_s3, 128, %s54_s11, [#allocation13], %s515_s15, %s515_s15, %s516_s16  }
  0x19   :  { %s454_s1 = scalar_lea.vmem %s23_s13, 128  ;;  %p459_p11 = scmp.lt.s32.totalorder %s23_s13, %s23_s13 }
  0x1a   :  { %p455_p10 = scmp.ne.s32.totalorder %s23_s13, %s454_s1  ;;  %p460_p12 = scmp.lt.s32.totalorder %s454_s1, %s454_s1 }
  0x1c   :  { %p461_p13 = por %p460_p12, %p459_p11 }
  0x1e   :  { %p462_p0 = pnand %p461_p13, %p455_p10 }
  0x20   :  { %465 = shalt.err (!%p462_p0)
}
  0x21   :  { %25 = dma.hbm_to_vmem [thread:$0]  %s613_s0, 128, %s23_s13, [#allocation8]  }
  0x22   :  { %s517_s21 = smov [#allocation11]   ;;  %s518_s23 = smov [#allocation14]  }
  0x23   :  { %s41_s22 = sshll.u32 %s517_s21, 4  ;;  %s67_s24 = sshll.u32 %s518_s23, 4  ;;  %s42_s22 = int_to_ptr.vmem [resolvable:$true] %s41_s22  ;;  %s68_s24 = int_to_ptr.vmem [resolvable:$true] %s67_s24 }
  0x24   :  { %s474_s25 = scalar_lea.vmem %s42_s22, 128  ;;  %p479_p2 = scmp.lt.s32.totalorder %s42_s22, %s42_s22 }
  0x25   :  { %p475_p1 = scmp.ne.s32.totalorder %s42_s22, %s474_s25  ;;  %p480_p3 = scmp.lt.s32.totalorder %s474_s25, %s474_s25 }
  0x27   :  { %p481_p4 = por %p480_p3, %p479_p2 }
  0x29   :  { %p482_p5 = pnand %p481_p4, %p475_p1 }
  0x2b   :  { %485 = shalt.err (!%p482_p5)
}
  0x2c   :  { %47 = dma.hbm_to_vmem [thread:$0]  %s615_s2, 128, %s42_s22, [#allocation10], %s515_s15, %s515_s15, %s516_s16  }
  0x2d   :  { %s494_s0 = scalar_lea.vmem %s68_s24, 256  ;;  %p499_p7 = scmp.lt.s32.totalorder %s68_s24, %s68_s24 }
  0x2e   :  { %p495_p6 = scmp.ne.s32.totalorder %s68_s24, %s494_s0  ;;  %p500_p8 = scmp.lt.s32.totalorder %s494_s0, %s494_s0 }
  0x30   :  { %p501_p9 = por %p500_p8, %p499_p7 }
  0x32   :  { %p502_p10 = pnand %p501_p9, %p495_p6 }
  0x34   :  { %505 = shalt.err (!%p502_p10)
}
  0x35   :  { %73 = dma.hbm_to_vmem [thread:$0]  %s618_s5, 256, %s68_s24, [#allocation13], %s515_s15, %s515_s15, %s516_s16  }
  0x36   :  { %506 = dma.done.wait [#allocation8], 128  }
  0x37   :  { %507 = vsyncadd [#allocation8], 4294967168 }
  0x38   :  { %508 = dma.done.wait [#allocation10], 256  }
  0x39   :  { %509 = vsyncadd [#allocation10], 4294967040 }
  0x3a   :  { %510 = dma.done.wait [#allocation13], 384  }
  0x3b   :  { %511 = vsyncadd [#allocation13], 4294966912  ;;  %v519_v0 = vmov 0.0   ;;  %vm520_vm0 = vmmov 0   ;;  %v394_v1 = vld [vmem:[#allocation12] sm:$0xff]   ;;  %v395_v2 = vld [vmem:[#allocation11] sm:$0xff]  }
  0x3c   :  { %362 = vmatprep.subr.bf16.mxu0 %v519_v0  ;;  %368 = vmatprep.subr.bf16.mxu1 %v519_v0  ;;  %v102_v3 = vld [vmem:[#allocation9] sm:$0xff]  ;;  %vm112_vm1 = vcmask 130048   ;;  %v98_v4 = vld [vmem:[#allocation7] sm:$0xff]  ;;  %v350_v11 = vld [vmem:[%s617_s4] ss:$0 sm:$0xff]  ;;  %vm215_vm2 = vcmask 257024  }
  0x3d   :  { %364 = vmatprep.mubr.msk.bf16.mxu0 %vm520_vm0, %v519_v0  ;;  %370 = vmatprep.mubr.msk.bf16.mxu1 %vm520_vm0, %v519_v0  ;;  %v103_v5 = vpack.c.bf16 %v102_v3, %v102_v3  ;;  %v99_v6 = vpack.c.bf16 %v98_v4, %v98_v4  ;;  %v396_v7 = vld [vmem:[#allocation14 + $0x8] sm:$0xff]   ;;  %v397_v8 = vld [vmem:[#allocation14] sm:$0xff]   ;;  %vm246_vm3 = vcmask 261120   ;;  %vm217_vm4 = vcmask 7168   ;;  %v351_v24 = vld [vmem:[%s619_s6] ss:$0 sm:$0xff] }
  0x3e   :  { %363 = vmatpush3.bf16.msra.mxu0 %v394_v1  ;;  %369 = vmatpush3.bf16.msra.mxu1 %v395_v2  ;;  %v521_v23 = vmov -inf   ;;  %219 = vst.msk [vmem:[#allocation4] sm:$0xff] %vm217_vm4, %v519_v0  ;;  %220 = vst.msk [vmem:[#allocation5] sm:$0xff] %vm217_vm4, %v519_v0  ;;  %v522_v30 = vmov 0   ;;  %v290_v39 = vld [vmem:[%s620_s7] sm:$0xff] }
  0x3f   :  { %374 = vmatprep.subr.bf16.mxu0 %v519_v0  ;;  %218 = vst.msk [vmem:[#allocation3] sm:$0xff] %vm217_vm4, %v521_v23  ;;  %221 = vst.msk [vmem:[#allocation6] sm:$0xff] %vm217_vm4, %v519_v0  ;;  %393 = vset.pattern.permute.xlu0 %v522_v30 }
  0x41   :  { %365 = vmatmul.mubr.msk.bf16.vlgmr.msra.gmra.mxu0 %vm112_vm1, %v103_v5  ;;  %371 = vmatmul.mubr.msk.bf16.vlgmr.msra.gmra.mxu1 %vm112_vm1, %v99_v6 }
  0x42   :  { %378 = vmatprep.mubr.msk.bf16.mxu0 %vm520_vm0, %v519_v0  ;;  %375 = vmatpush3.bf16.msra.mxu0 %v396_v7 }
  0x43   :  { %376 = vmatprep.subr.bf16.mxu0 %v519_v0 }
  0x45   :  { %v298_v43 = vld [vmem:[#allocation4] sm:$0xff]  ;;  %v313_v50 = vld [vmem:[#allocation5] sm:$0xff] }
  0x46   :  { %377 = vmatpush3.bf16.msra.mxu0 %v397_v8  ;;  %v291_v31 = vld [vmem:[#allocation3] sm:$0xff]  ;;  %v319_v47 = vld [vmem:[#allocation6] sm:$0xff] }
 0x101   :  { %v150_v9 = vpop.f32.mrf.mxu0  ;;  %v199_v10 = vpop.f32.mrf.mxu1 }
 0x102   :  { %v200_v12 = vadd.f32 %v199_v10, %v150_v9 }
 0x103   :  { %v366_v13 = vpop.f32.mrf.mxu0  ;;  %v372_v14 = vpop.f32.mrf.mxu1 }
 0x104   :  { %v212_v15 = vadd.f32 %v350_v11, %v200_v12 }
 0x105   :  { %v153_v16 = vpop.f32.mrf.mxu0  ;;  %v202_v17 = vpop.f32.mrf.mxu1 }
 0x106   :  { %v213_v18 = vmax.f32 %v212_v15, 0.0 }
 0x107   :  { %v367_v19 = vpop.f32.mrf.mxu0  ;;  %v373_v20 = vpop.f32.mrf.mxu1 }
 0x108   :  { %v214_v21 = vpack.c.bf16 %v213_v18, %v213_v18 }
 0x10a   :  { %216 = vst.msk [vmem:[#allocation2] sm:$0xf] %vm215_vm2, %v214_v21 }
 0x111   :  { %v222_v22 = vld [vmem:[#allocation2] sm:$0xf] }
 0x112   :  { %379 = vmatmul.mubr.msk.bf16.vlgmr.msra.gmra.mxu0 %vm246_vm3, %v222_v22 }
 0x1d2   :  { %v284_v25 = vpop.f32.mrf.mxu0 }
 0x1d3   :  { %v285_v26 = vadd.f32 %v351_v24, %v284_v25 }
 0x1d4   :  { %v380_v27 = vpop.f32.mrf.mxu0 }
 0x1d5   :  { %292 = vmax.xlane.f32.xlu0 %v285_v26  ;;  %v314_v40 = vmul.f32 %v290_v39, %v285_v26 }
 0x1d6   :  { %v287_v28 = vpop.f32.mrf.mxu0 }
 0x1d8   :  { %v381_v29 = vpop.f32.mrf.mxu0 }
 0x25e   :  { %v293_v32 = vpop.xlane.xlu0 %292 }
 0x25f   :  { %v294_v33 = vmax.f32 %v291_v31, %v293_v32 }
 0x261   :  { %v295_v34 = vsub.f32 %v291_v31, %v294_v33  ;;  %324 = vst.msk [vmem:[#allocation3] sm:$0xff] %vm217_vm4, %v294_v33  ;;  %302 = vperm.xlu0 %393, %v294_v33  }
 0x263   :  { %v296_v41 = vmul.f32 1.442695, %v295_v34 }
 0x268   :  { %v328_v58 = vld [vmem:[#allocation3] sm:$0xff] }
 0x2dc   :  { %v303_v35 = vpop.permute.xlu0 %302 }
 0x2dd   :  { %v305_v36 = vsub.f32 %v285_v26, %v303_v35 }
 0x2df   :  { %v306_v37 = vmul.f32 1.442695, %v305_v36 }
 0x2e1   :  { %398 = vpow2.f32 %v306_v37 }
 0x2e2   :  { %400 = vpow2.f32 %v296_v41 }
 0x2ee   :  { %v399_v38 = vpop.eup %398 }
 0x2ef   :  { %308 = vadd.xlane.f32.xlu1 %v399_v38  ;;  %v401_v42 = vpop.eup %400 }
 0x2f0   :  { %v299_v44 = vmul.f32 %v401_v42, %v298_v43 }
 0x2f3   :  { %320 = vadd.xlane.f32.xlu1 %v290_v39 }
 0x2f7   :  { %315 = vadd.xlane.f32.xlu1 %v314_v40 }
 0x378   :  { %v309_v45 = vpop.xlane.xlu1 %308 }
 0x379   :  { %v310_v46 = vadd.f32 %v309_v45, %v299_v44 }
 0x37b   :  { %312 = vst.msk [vmem:[#allocation4] sm:$0xff] %vm217_vm4, %v310_v46 }
 0x37c   :  { %v321_v48 = vpop.xlane.xlu1 %320 }
 0x37d   :  { %v322_v49 = vadd.f32 %v321_v48, %v319_v47 }
 0x37f   :  { %323 = vst.msk [vmem:[#allocation6] sm:$0xff] %vm217_vm4, %v322_v49 }
 0x380   :  { %v316_v51 = vpop.xlane.xlu1 %315 }
 0x381   :  { %v317_v52 = vadd.f32 %v316_v51, %v313_v50 }
 0x382   :  { %v329_v53 = vld [vmem:[#allocation4] sm:$0xff] }
 0x383   :  { %402 = vlog2.f32 %v329_v53  ;;  %318 = vst.msk [vmem:[#allocation5] sm:$0xff] %vm217_vm4, %v317_v52 }
 0x386   :  { %v334_v54 = vld [vmem:[#allocation6] sm:$0xff] }
 0x387   :  { %404 = vrcp.f32 %v334_v54 }
 0x38a   :  { %v333_v59 = vld [vmem:[#allocation5] sm:$0xff] }
 0x390   :  { %v403_v55 = vpop.eup %402 }
 0x391   :  { %v331_v56 = vmul.f32 0.6931472, %v403_v55 }
 0x393   :  { %v332_v60 = vadd.f32 %v331_v56, %v328_v58 }
 0x394   :  { %v405_v57 = vpop.eup %404 }
 0x395   :  { %v336_v61 = vmul.f32 %v405_v57, %v333_v59 }
 0x397   :  { %v337_v62 = vsub.f32 %v332_v60, %v336_v61 }
 0x399   :  { %338 = vst.msk [vmem:[%s621_s8] sm:$0xff] %vm217_vm4, %v337_v62 }
 0x39a   :  { %343 = vsyncpa [#allocation8], 1 }
 0x39b   :  { %344 = vsyncpa [#allocation10], 1 }
 0x39c   :  { %345 = vsyncpa [#allocation13], 1 }

</bundles_post_ra>
